<compile_context>
chip_gen: v7x
topology: tpu7x:2x2x1
jax: 0.10.0
libtpu: 0.0.40
codegen_flags: <defaults>
</compile_context>

<pallas_src>
import jax
import jax.numpy as jnp
from jax.experimental import pallas as pl
from jax.experimental.pallas import tpu as pltpu

ADL_DROP_RATE = 0.75
ADL_DROP_THRESHOLD = 0.8

# Sentinel for spatial padding: far below any realistic activation so it never
# wins the per-sample spatial max; padded lanes are sliced off after the call.
_PAD_VALUE = -1e30


def _adl_kernel(binary_ref, x_ref, o_ref):
    # binary_ref: SMEM scalar (int32, 0 or 1), shared by the whole batch.
    # x_ref / o_ref: (TB, C, S_pad) block; last dim is lane-dense (mult of 128).
    binary = binary_ref[0]

    x = x_ref[...].astype(jnp.float32)                       # (TB, C, S)

    # attention = per-sample mean over the channel dim (sublane reduction).
    attention = jnp.mean(x, axis=1, keepdims=True)           # (TB, 1, S)

    # drop mask: per-sample spatial max (lane reduction), threshold, binarize.
    max_val = jnp.max(attention, axis=2, keepdims=True)      # (TB, 1, 1)
    thr_val = max_val * ADL_DROP_THRESHOLD
    drop_mask = (attention < thr_val).astype(jnp.float32)    # (TB, 1, S)

    # importance map (EUP sigmoid).
    importance_map = jax.nn.sigmoid(attention)               # (TB, 1, S)

    # Scalar-predicated select (robust to binary in {0,1}, no full-tile blend).
    selected_map = jnp.where(binary == 1, drop_mask, importance_map)

    o_ref[...] = (x * selected_map).astype(o_ref.dtype)


def _choose_tb(batch, per_sample_bytes, target_block_bytes=4 * 1024 * 1024):
    """Largest divisor of `batch` whose block stays under the VMEM target,
    while keeping >=2 grid steps when possible (v7x megacore)."""
    max_tb = max(1, target_block_bytes // max(per_sample_bytes, 1))
    tb = 1
    for d in range(1, batch + 1):
        if batch % d == 0 and d <= max_tb:
            tb = d
    if tb == batch and batch > 1 and batch % 2 == 0:
        tb = batch // 2  # give both TensorCores a grid step
    return tb


def adl_forward(x, binary, *, training=True):
    """x: (B, C, H, W); binary: (1,) int32 in {0, 1} (the shared Bernoulli coin)."""
    if not training:
        return x

    B, C, H, W = x.shape
    S = H * W
    S_pad = ((S + 127) // 128) * 128

    # Flatten spatial dims so the lane axis is wide and 128-dense.
    x_flat = x.reshape(B, C, S)
    if S_pad != S:
        pad = jnp.full((B, C, S_pad - S), _PAD_VALUE, dtype=x.dtype)
        x_flat = jnp.concatenate([x_flat, pad], axis=-1)

    per_sample_bytes = C * S_pad * x.dtype.itemsize
    tb = _choose_tb(B, per_sample_bytes)
    grid = (B // tb,)

    out_flat = pl.pallas_call(
        _adl_kernel,
        out_shape=jax.ShapeDtypeStruct((B, C, S_pad), x.dtype),
        grid_spec=pltpu.PrefetchScalarGridSpec(
            num_scalar_prefetch=1,
            grid=grid,
            in_specs=[
                pl.BlockSpec((tb, C, S_pad), lambda b, bin_ref: (b, 0, 0)),
            ],
            out_specs=pl.BlockSpec((tb, C, S_pad), lambda b, bin_ref: (b, 0, 0)),
        ),
        compiler_params=pltpu.CompilerParams(
            dimension_semantics=("parallel",)),
    )(binary, x_flat)

    if S_pad != S:
        out_flat = out_flat[..., :S]
    return out_flat.reshape(B, C, H, W)


def adl_reference(x, binary):
    # Pure-JAX reference of the PyTorch forward (training mode).
    attention = jnp.mean(x.astype(jnp.float32), axis=1, keepdims=True)
    importance_map = jax.nn.sigmoid(attention)
    b = x.shape[0]
    max_val = jnp.max(attention.reshape(b, -1), axis=1).reshape(b, 1, 1, 1)
    thr_val = max_val * ADL_DROP_THRESHOLD
    drop_mask = (attention < thr_val).astype(jnp.float32)
    binary_s = binary[0].astype(jnp.float32)
    selected_map = (1.0 - binary_s) * importance_map + binary_s * drop_mask
    return (x.astype(jnp.float32) * selected_map).astype(x.dtype)


if __name__ == "__main__":
    key = jax.random.PRNGKey(0)
    kx, kcoin = jax.random.split(key)

    B, C, H, W = 2, 4, 16, 16
    x = jax.random.normal(kx, (B, C, H, W), dtype=jnp.float32)

    # _select_map: random_tensor = rand([]) + drop_rate; binary = floor(random_tensor)
    # (single coin shared by the whole batch, matching torch.rand([])).
    rand_scalar = jax.random.uniform(kcoin, (), dtype=jnp.float32)
    binary = jnp.floor(rand_scalar + ADL_DROP_RATE).astype(jnp.int32).reshape(1)

    out = adl_forward(x, binary, training=True)
    out = jax.block_until_ready(out)

    ref = adl_reference(x, binary)
    assert out.shape == x.shape and out.dtype == x.dtype
    assert jnp.allclose(out, ref, atol=1e-5, rtol=1e-5), "mismatch vs reference"

    # Exercise the other branch of the coin as well (both importance & drop paths).
    binary_other = (1 - binary).astype(jnp.int32)
    out2 = jax.block_until_ready(adl_forward(x, binary_other, training=True))
    ref2 = adl_reference(x, binary_other)
    assert jnp.allclose(out2, ref2, atol=1e-5, rtol=1e-5), "mismatch vs reference (other branch)"

    # Exercise the spatial-padding path (H*W not a multiple of 128).
    x_odd = jax.random.normal(kx, (2, 4, 7, 7), dtype=jnp.float32)
    out_odd = jax.block_until_ready(adl_forward(x_odd, binary, training=True))
    ref_odd = adl_reference(x_odd, binary)
    assert jnp.allclose(out_odd, ref_odd, atol=1e-5, rtol=1e-5), "mismatch vs reference (padded)"

    # Eval mode is identity, matching PyTorch's `if not self.training: return input_`.
    out_eval = adl_forward(x, binary, training=False)
    assert jnp.array_equal(out_eval, x)

    print("KERNEL_OK")
</pallas_src>

<mosaic_0001>
module attributes {stable_mosaic.version = 11 : i64} {
  func.func @_adl_kernel(%arg0: i32, %arg1: memref<1xi32, #tpu.memory_space<smem>>, %arg2: memref<1x4x256xf32, #tpu.memory_space<vmem>>, %arg3: memref<1x4x256xf32, #tpu.memory_space<vmem>>) attributes {dimension_semantics = [#tpu.dimension_semantics<parallel>], iteration_bounds = array<i64: 2>, scalar_prefetch = 1 : i64, scratch_operands = 0 : i64, tpu.core_type = #tpu.core_type<tc>, window_params = [{transform_indices = @transform_0, window_bounds = array<i64: 1, 4, 256>}, {transform_indices = @transform_1, window_bounds = array<i64: 1, 4, 256>}]} {
    %c0 = arith.constant 0 : index
    %0 = memref.load %arg1[%c0] : memref<1xi32, #tpu.memory_space<smem>>
    %c0_0 = arith.constant 0 : index
    %c0_1 = arith.constant 0 : index
    %c0_2 = arith.constant 0 : index
    %1 = vector.load %arg2[%c0_0, %c0_1, %c0_2] : memref<1x4x256xf32, #tpu.memory_space<vmem>>, vector<1x4x256xf32>
    %cst = arith.constant dense<0.000000e+00> : vector<1x256xf32>
    %2 = vector.multi_reduction <add>, %1, %cst [1] : vector<1x4x256xf32> to vector<1x256xf32>
    %3 = vector.shape_cast %2 : vector<1x256xf32> to vector<1x1x256xf32>
    %cst_3 = arith.constant 4.000000e+00 : f32
    %4 = vector.broadcast %cst_3 : f32 to vector<1x1x256xf32>
    %5 = arith.divf %3, %4 : vector<1x1x256xf32>
    %cst_4 = arith.constant dense<0xFF800000> : vector<1x1xf32>
    %6 = vector.multi_reduction <maximumf>, %5, %cst_4 [2] : vector<1x1x256xf32> to vector<1x1xf32>
    %7 = vector.shape_cast %6 : vector<1x1xf32> to vector<1x1x1xf32>
    %cst_5 = arith.constant 8.000000e-01 : f32
    %8 = vector.broadcast %cst_5 : f32 to vector<1x1x1xf32>
    %9 = arith.mulf %7, %8 : vector<1x1x1xf32>
    %10 = vector.broadcast %9 : vector<1x1x1xf32> to vector<1x1x256xf32>
    %11 = arith.cmpf olt, %5, %10 : vector<1x1x256xf32>
    %12 = arith.extui %11 : vector<1x1x256xi1> to vector<1x1x256xi32>
    %13 = arith.sitofp %12 : vector<1x1x256xi32> to vector<1x1x256xf32>
    %14 = arith.negf %5 : vector<1x1x256xf32>
    %15 = math.exp %14 : vector<1x1x256xf32>
    %cst_6 = arith.constant 1.000000e+00 : f32
    %16 = vector.broadcast %cst_6 : f32 to vector<1x1x256xf32>
    %17 = arith.addf %16, %15 : vector<1x1x256xf32>
    %18 = arith.divf %16, %17 : vector<1x1x256xf32>
    %c1_i32 = arith.constant 1 : i32
    %19 = arith.cmpi eq, %0, %c1_i32 : i32
    %20 = arith.select %19, %13, %18 : vector<1x1x256xf32>
    %21 = vector.broadcast %20 : vector<1x1x256xf32> to vector<1x4x256xf32>
    %22 = arith.mulf %1, %21 : vector<1x4x256xf32>
    %c0_7 = arith.constant 0 : index
    %c0_8 = arith.constant 0 : index
    %c0_9 = arith.constant 0 : index
    %23 = vector.load %arg3[%c0_7, %c0_8, %c0_9] : memref<1x4x256xf32, #tpu.memory_space<vmem>>, vector<1x4x256xf32>
    tpu.vector_store %arg3[%c0_7, %c0_8, %c0_9], %22 {strides = array<i32>} : memref<1x4x256xf32, #tpu.memory_space<vmem>>, vector<1x4x256xf32>,
    return
  }
  func.func @transform_0(%arg0: i32, %arg1: memref<1xi32, #tpu.memory_space<smem>>) -> (i32, i32, i32) {
    %c0_i32 = arith.constant 0 : i32
    %c0_i32_0 = arith.constant 0 : i32
    %c0_i32_1 = arith.constant 0 : i32
    return %arg0, %c0_i32, %c0_i32_0 : i32, i32, i32
  }
  func.func @transform_1(%arg0: i32, %arg1: memref<1xi32, #tpu.memory_space<smem>>) -> (i32, i32, i32) {
    %c0_i32 = arith.constant 0 : i32
    %c0_i32_0 = arith.constant 0 : i32
    %c0_i32_1 = arith.constant 0 : i32
    return %arg0, %c0_i32, %c0_i32_0 : i32, i32, i32
  }
}

</mosaic_0001>

<bundles_post_ra>
// kernel: tpu_custom_call.1
= control target key start
LH: loop header
LB: loop body
LE: loop exit
PB: predicated region body
PF: predicated region fallthrough
CT: control target
= control target key end

     0   :  { %s637_s0 = inlined_call_operand.<no memory space> [shape: s32[1], index: 0, kind: input, shape index: {}]   ;;  %s638_s1 = inlined_call_operand.hbm [shape: f32[2,4,256], index: 1, kind: input, shape index: {}]   ;;  %s639_s2 = inlined_call_operand.hbm [shape: f32[2,4,256], index: 2, kind: output, shape index: {}]  }
   0x1   :  { %7 = sst [smem:[#allocation3]] %s637_s0 }
   0x2   :  { %8 = vsyncpa [#allocation5], 0 }
   0x3   :  { %10 = vsyncpa [#allocation5 + $0x1], 0 }
   0x4   :  { %11 = vsyncpa [#allocation6], 0 }
   0x5   :  { %13 = vsyncpa [#allocation6 + $0x1], 0  ;;  %s472_s11 = smov 0   ;;  %s474_s12 = smov 0  }
   0x6   :  { %s476_s13 = smov 0   ;;  %s478_s14 = smov 0  }
   0x7 LB: > { %s493_s0 = sadd.s32 4294967295, %s449_s14   ;;  %s277_s15 = sadd.s32 4294967294, %s449_s14   ;;  %s449_s14 = sphi %s478_s14, %s654_s14   ;;  %s445_s13 = sphi %s476_s13, %s653_s13   ;;  %s441_s12 = sphi %s474_s12, %s652_s12   ;;  %s437_s11 = sphi %s472_s11, %s651_s11  }
   0x8   : > { %s497_s16 = sadd.s32 1, %s449_s14   ;;  %s26_s17 = sadd.s32 1, %s445_s13 }
   0x9   : > { %s23_s18 = ssub.s32 %s449_s14, %s497_s16  ;;  %p33_p0 = scmp.ne.s32.totalorder %s445_s13, %s441_s12 }
   0xa   : > { %p24_p1 = scmp.eq.s32.totalorder %s23_s18, 0  ;;  %p34_p2 = scmp.eq.s32.totalorder %s449_s14, 0 }
   0xb   : > { %p39_p3 = scmp.ne.s32.totalorder %s441_s12, %s437_s11  ;;  %p40_p4 = scmp.eq.s32.totalorder %s493_s0, 0 }
   0xc   : > { %s509_s19 = scalar_select %p24_p1, %s445_s13, %s26_s17  }
   0xd   : > { %p511_p5 = por %p34_p2, %p33_p0  ;;  %p515_p6 = por %p40_p4, %p39_p3 }
   0xe   : > { %p63_p7 = scmp.eq.s32.totalorder %s493_s0, 1  ;;  %p69_p8 = scmp.eq.s32.totalorder %s277_s15, 1 }
   0xf   : > { %p309_p10 = scmp.lt.s32.totalorder %s449_s14, 2  ;;  %s89_s24 = sand.u32 1, %s445_s13  }
  0x10   : > { %p522_p11 = por %p63_p7, %p33_p0  ;;  %p526_p12 = por %p69_p8, %p39_p3 }
  0x11   : > { %s295_s25 = sshll.u32 %s449_s14, 7  ;;  %s280_s26 = sshll.u32 %s89_s24, 3 }
  0x12   : > { %s643_s22 = scalar_select %p522_p11, 1, 0 }
  0x13   : > { %s644_s23 = scalar_select %p526_p12, 1, 0 }
  0x14   : > { %s535_s29 = scalar_lea.hbm %s638_s1, %s295_s25  ;;  %s93_s30 = scalar_lea.vmem [#allocation4], %s280_s26 }
  0x15   : > { %s101_s3 = sshll.u32 %s93_s30, 4  ;;  %p539_p13 = pnand %p309_p10, %p511_p5  ;;  %s543_s3 = int_to_ptr.vmem [resolvable:$true] %s101_s3 }
  0x16   : > { %s90_s5 = scalar_lea.sflag [#allocation5], %s89_s24  ;;  %s353_s6 = scalar_lea.hbm %s535_s29, 128 }
  0x17   : > { %p354_p2 = scmp.ne.s32.totalorder %s535_s29, %s353_s6  ;;  %p355_p3 = pneg %p539_p13 }
  0x18   : > { %s358_s9 = scalar_lea.hbm %s638_s1, 256  ;;  %p359_p5 = scmp.lt.u32.totalorder %s535_s29, %s638_s1 }
  0x19   : > { %p356_p4 = pnand %p355_p3, %p354_p2  ;;  %p360_p8 = scmp.lt.u32.totalorder %s358_s9, %s353_s6 }
  0x1a   : > { %p362_p9 = scmp.lt.u32.totalorder %s353_s6, %s535_s29 }
  0x1b   : > { %p357_p7 = pneg %p356_p4  ;;  %p361_p10 = por %p360_p8, %p359_p5 }
  0x1d   : > { %p363_p0 = por %p362_p9, %p361_p10 }
  0x1f   : > { %p364_p1 = pnand %p363_p0, %p357_p7 }
  0x21   : > { %367 = shalt.err (!%p364_p1)
}
  0x22   : > { %s368_s17 = scalar_lea.vmem %s543_s3, 128  ;;  %s451_s18 = smov [#allocation4]  }
  0x23   : > { %p369_p2 = scmp.ne.s32.totalorder %s543_s3, %s368_s17  ;;  %s373_s20 = sshll.u32 %s451_s18, 4  ;;  %s374_s20 = int_to_ptr.vmem [resolvable:$false] %s373_s20 }
  0x24   : > { %s375_s24 = scalar_lea.vmem %s374_s20, 256  ;;  %p376_p11 = scmp.lt.s32.totalorder %s543_s3, %s374_s20 }
  0x25   : > { %p371_p4 = pnand %p369_p2, %p355_p3  ;;  %p377_p5 = scmp.lt.s32.totalorder %s375_s24, %s368_s17 }
  0x27   : > { %p372_p12 = pneg %p371_p4  ;;  %p378_p8 = por %p377_p5, %p376_p11 }
  0x29   : > { %p379_p9 = pnand %p378_p8, %p372_p12 }
  0x2b   : > { %382 = shalt.err (!%p379_p9)
}
  0x2c   : > { %304 = dma.hbm_to_vmem [thread:$0]  (!%p539_p13), %s535_s29, 128, %s543_s3, %s90_s5  }
  0x2d   : > { %p646_p0 = scmp.lt.s32.totalorder %s449_s14, 3  ;;  %p647_p1 = scmp.ge.s32.totalorder %s449_s14, 1 }
  0x2f   : > { %p107_p3 = pnand %p647_p1, %p646_p0 }
  0x30   : > { %s577_s25 = sand.u32 (!%p107_p3), 1, %s441_s12  }
  0x31   : > { %110 = sbr.rel (%p107_p3) target bundleno = 242 (0xf2), region = 24  ;;  %s284_s26 = sshll.u32 (!%p107_p3), %s577_s25, 3 }
  0x32   : > { %s113_s27 = scalar_lea.sflag (!%p107_p3), [#allocation5], %s577_s25  ;;  %s116_s28 = scalar_lea.vmem (!%p107_p3), [#allocation4], %s284_s26 }
  0x38   : > { %428 = dma.done.wait (%p515_p6), %s113_s27, 128  }
  0x39   : > { %430 = vsyncadd (%p515_p6), %s113_s27, 4294967168  ;;  %vm140_vm0 = vcmask 1043456   ;;  %v136_v0 = vld [vmem:[%s116_s28] sm:$0xff]  ;;  %s135_s21 = sld [smem:[#allocation3]]  ;;  %v452_v32 = vmov 0.0   ;;  %s296_s30 = sshll.u32 %s493_s0, 7 }
  0x3a   : > { %v138_v1 = vcombine.high %v136_v0, %v136_v0  ;;  %v141_v2 = vsel %vm140_vm0, %v136_v0, 0.0  ;;  %s134_s3 = scalar_lea.vmem [#allocation7], %s284_s26  ;;  %s593_s7 = scalar_lea.hbm %s639_s2, %s296_s30 }
  0x3b   : > { %v142_v3 = vrot.slane %v141_v2, 4  ;;  %s207_s4 = sshll.u32 %s134_s3, 4  ;;  %s193_s8 = scalar_lea.sflag [#allocation6], %s577_s25  ;;  %s595_s4 = int_to_ptr.vmem [resolvable:$true] %s207_s4 }
  0x3c   : > { %v148_v4 = vsel %vm140_vm0, %v138_v1, 0.0  ;;  %s383_s9 = scalar_lea.vmem %s595_s4, 128  ;;  %p648_p12 = scmp.ne.s32.totalorder %s643_s22, 0 }
  0x3d   : > { %v143_v5 = vadd.f32 %v142_v3, %v141_v2  ;;  %v149_v6 = vrot.slane %v148_v4, 4  ;;  %p384_p11 = scmp.ne.s32.totalorder %s595_s4, %s383_s9  ;;  %s453_s0 = smov [#allocation7]  }
  0x3e   : > { %s387_s10 = sshll.u32 %s453_s0, 4  ;;  %s388_s10 = int_to_ptr.vmem [resolvable:$false] %s387_s10 }
  0x3f   : > { %v144_v7 = vrot.slane %v143_v5, 2  ;;  %v150_v8 = vadd.f32 %v149_v6, %v148_v4  ;;  %p180_p6 = scmp.eq.s32.totalorder %s135_s21, 1  ;;  %p385_p13 = pnand %p384_p11, %p648_p12 }
  0x40   : > { %s389_s15 = scalar_lea.vmem %s388_s10, 256  ;;  %p390_p10 = scmp.lt.s32.totalorder %s595_s4, %s388_s10 }
  0x41   : > { %v145_v9 = vadd.f32 %v144_v7, %v143_v5  ;;  %v151_v10 = vrot.slane %v150_v8, 2  ;;  %s181_s29 = scalar_select %p180_p6, 1, 0 }
  0x42   : > { %p386_p7 = pneg %p385_p13  ;;  %p391_p2 = scmp.lt.s32.totalorder %s389_s15, %s383_s9 }
  0x43   : > { %v146_v11 = vrot.slane %v145_v9, 1  ;;  %v152_v12 = vadd.f32 %v151_v10, %v150_v8  ;;  %v182_v27 = vstv %s181_s29 }
  0x44   : > { %vm183_vm1 = vcmp.eq.s32.totalorder %v182_v27, 1  ;;  %p392_p4 = por %p391_p2, %p390_p10 }
  0x45   : > { %v147_v13 = vadd.f32 %v146_v11, %v145_v9  ;;  %v153_v14 = vrot.slane %v152_v12, 1 }
  0x46   : > { %p393_p5 = pnand %p392_p4, %p386_p7 }
  0x47   : > { %v154_v15 = vadd.f32 %v153_v14, %v152_v12  ;;  %v156_v16 = vmul.f32 0.25, %v147_v13  ;;  %v288_v19 = vmul.f32 -0.25, %v147_v13 }
  0x49   : > { %v157_v17 = vmul.f32 0.25, %v154_v15  ;;  %v289_v20 = vmul.f32 -0.25, %v154_v15  ;;  %v170_v21 = vmul.f32 1.442695, %v288_v19 }
  0x4b   : > { %v158_v18 = vmax.f32 %v156_v16, %v157_v17  ;;  %v172_v22 = vmul.f32 1.442695, %v289_v20  ;;  %345 = vpow2.f32 %v170_v21 }
  0x4d   : > { %159 = vmax.xlane.f32.xlu0 %v158_v18  ;;  %347 = vpow2.f32 %v172_v22 }
  0x55   : > { %v346_v23 = vpop.eup %345 }
  0x56   : > { %v174_v25 = vadd.f32 1.0, %v346_v23 }
  0x57   : > { %v348_v24 = vpop.eup %347 }
  0x58   : > { %v175_v26 = vadd.f32 1.0, %v348_v24  ;;  %349 = vrcp.f32 %v174_v25 }
  0x5a   : > { %351 = vrcp.f32 %v175_v26 }
  0x62   : > { %v350_v29 = vpop.eup %349 }
  0x64   : > { %v352_v31 = vpop.eup %351 }
  0xda   : > { %v160_v28 = vpop.xlane.xlu0 %159 }
  0xdb   : > { %v161_v30 = vmul.f32 0.8, %v160_v28 }
  0xdd   : > { %vm162_vm2 = vcmp.lt.f32.partialorder %v156_v16, %v161_v30  ;;  %vm163_vm3 = vcmp.lt.f32.partialorder %v157_v17, %v161_v30 }
  0xde   : > { %v286_v33 = vsel %vm162_vm2, 1.0, %v452_v32  ;;  %v287_v34 = vsel %vm163_vm3, 1.0, %v452_v32 }
  0xdf   : > { %v184_v35 = vsel %vm183_vm1, %v286_v33, %v350_v29  ;;  %v185_v36 = vsel %vm183_vm1, %v287_v34, %v352_v31 }
  0xe0   : > { %v188_v37 = vcombine.low %v184_v35, %v185_v36 }
  0xe2   : > { %v190_v38 = vmul.f32 %v188_v37, %v136_v0 }
  0xe4   : > { %191 = vst [vmem:[%s134_s3] sm:$0xff] %v190_v38 }
  0xe5   : > { %396 = shalt.err (!%p393_p5)
}
  0xe6   : > { %s397_s17 = scalar_lea.hbm %s593_s7, 128  ;;  %s401_s24 = scalar_lea.hbm %s639_s2, 256 }
  0xe7   : > { %p398_p8 = scmp.ne.s32.totalorder %s593_s7, %s397_s17  ;;  %p402_p1 = scmp.lt.u32.totalorder %s593_s7, %s639_s2 }
  0xe8   : > { %p403_p3 = scmp.lt.u32.totalorder %s401_s24, %s397_s17  ;;  %p405_p11 = scmp.lt.u32.totalorder %s397_s17, %s593_s7 }
  0xe9   : > { %p399_p9 = pnand %p398_p8, %p648_p12 }
  0xea   : > { %p404_p6 = por %p403_p3, %p402_p1 }
  0xeb   : > { %p400_p0 = pneg %p399_p9 }
  0xec   : > { %p406_p13 = por %p405_p11, %p404_p6 }
  0xee   : > { %p407_p7 = pnand %p406_p13, %p400_p0 }
  0xf0   : > { %410 = shalt.err (!%p407_p7)
}
  0xf1   : > { %299 = dma.vmem_to_hbm [thread:$0]  (%p648_p12), %s595_s4, 128, %s593_s7, %s193_s8  }
  0xf2 PF: > { %s219_s27 = sand.u32 1, %s437_s11   ;;  %p649_p10 = scmp.ne.s32.totalorder %s644_s23, 0 }
  0xf3   : > { %p650_p2 = scmp.ge.s32.totalorder %s449_s14, 2  ;;  %s220_s28 = scalar_lea.sflag [#allocation6], %s219_s27 }
  0xf5   : > { %p306_p4 = pnand %p650_p2, %p649_p10 }
  0xf7   : > { %432 = dma.done.wait (!%p306_p4), %s220_s28, 128  }
  0xf8   : > { %434 = vsyncadd (!%p306_p4), %s220_s28, 4294967168  ;;  %p16_p5 = scmp.ge.s32.totalorder %s497_s16, 4   ;;  %s651_s11 = smov %s441_s12 }
  0xf9   : > { %s652_s12 = smov %s445_s13  ;;  %s653_s13 = smov %s509_s19 }
  0xfa   : > { %s654_s14 = smov %s497_s16  ;;  %18 = sbr.rel (!%p16_p5) target bundleno = 7 (0x7), region = 69 }
 0x101   :  { %225 = vsyncpa [#allocation5], 1 }
 0x102   :  { %227 = vsyncpa [#allocation5 + $0x1], 1 }
 0x103   :  { %228 = vsyncpa [#allocation6], 1 }
 0x104   :  { %230 = vsyncpa [#allocation6 + $0x1], 1 }

</bundles_post_ra>
